<compile_context>
chip_gen: v7x
topology: tpu7x:2x2x1
jax: 0.10.0
libtpu: 0.0.40
codegen_flags: <defaults>
</compile_context>

<pallas_src>
import math
from functools import partial

import jax
import jax.numpy as jnp
from jax.experimental import pallas as pl
from jax.experimental.pallas import tpu as pltpu


def _round_up(n, m):
    return ((n + m - 1) // m) * m


def net_kernel(x_ref, w_ref, b_ref, o_ref):
    # Single MXU pass per tile: (TBR, F*S) @ (F*S, F*A) + (1, F*A).
    acc = jnp.dot(x_ref[...], w_ref[...], preferred_element_type=jnp.float32)
    o_ref[...] = (acc + b_ref[...]).astype(o_ref.dtype)


@partial(jax.jit, static_argnames=("tb",))
def net_forward(x, w1, b1, w2, b2, *, tb=8192):
    """Pallas forward for Net: fc2(fc1(x)), no nonlinearity.

    x : (B, n_states) float32
    w1: (n_states, n_hiddens)   b1: (1, n_hiddens)
    w2: (n_hiddens, n_actions)  b2: (1, n_actions)
    returns (B, n_actions) float32
    """
    B, S = x.shape
    A = w2.shape[1]

    # Fold factor: F batch rows share one lane-dense output row (F*A = lcm(128, A)).
    F = 128 // math.gcd(128, A)      # A=4 -> F=32
    FS = F * S                       # folded input width  (512 for S=16)
    AL = F * A                       # folded output width (128 for A=4)

    # ---- Tiny one-time weight prep (fused by XLA under jit). ----------------
    w_fused = jnp.dot(w1, w2, preferred_element_type=jnp.float32)        # (S, A)
    b_fused = jnp.dot(b1, w2, preferred_element_type=jnp.float32) + b2   # (1, A)
    # Block-diagonal fold: kron(I_F, w_fused) maps F concatenated input rows
    # to F concatenated output rows -> output stores are fully lane-dense.
    w_bd = jnp.kron(jnp.eye(F, dtype=w_fused.dtype), w_fused)            # (FS, AL)
    b_bd = jnp.tile(b_fused, (1, F))                                     # (1, AL)

    # ---- Fold the batch: (B, S) -> (B/F, F*S) is a free row-major reshape.
    # Only pads (one extra pass over x) when B % F != 0.
    Bf = _round_up(B, F)
    if Bf != B:
        x = jnp.pad(x, ((0, Bf - B), (0, 0)))
    R = Bf // F
    x_fold = x.reshape(R, FS)

    # ---- Row tiling.  Ragged last block handled by Pallas (cdiv grid), no
    # row padding.  Keep >=2 blocks when possible so both v7x TCs get work.
    if R <= 8:
        TBR = R                      # full dim, single block
    else:
        TBR = min(max(8, tb // F), _round_up(pl.cdiv(R, 2), 8))
    n_blocks = pl.cdiv(R, TBR)

    x_blk_bytes = TBR * FS * 4
    o_blk_bytes = TBR * AL * 4
    w_bytes = FS * AL * 4 + AL * 4
    vmem_limit = min(
        64 << 20, max(2 << 20, 2 * (x_blk_bytes + o_blk_bytes) + w_bytes + (1 << 20))
    )

    out = pl.pallas_call(
        net_kernel,
        out_shape=jax.ShapeDtypeStruct((R, AL), x.dtype),
        grid=(n_blocks,),
        in_specs=[
            pl.BlockSpec((TBR, FS), lambda i: (i, 0)),   # folded x tile, pipelined
            pl.BlockSpec((FS, AL), lambda i: (0, 0)),    # block-diag fused W, resident
            pl.BlockSpec((1, AL), lambda i: (0, 0)),     # folded bias, resident
        ],
        out_specs=pl.BlockSpec((TBR, AL), lambda i: (i, 0)),
        compiler_params=pltpu.CompilerParams(
            dimension_semantics=("parallel",),
            vmem_limit_bytes=vmem_limit,
        ),
        cost_estimate=pl.CostEstimate(
            flops=2 * R * FS * AL,
            transcendentals=0,
            bytes_accessed=Bf * S * 4 + w_bytes + Bf * A * 4,
        ),
    )(x_fold, w_bd, b_bd)

    # (R, F*A) row-major is exactly the folded y; unfold and drop pad rows.
    y = out.reshape(Bf, A)
    if Bf != B:
        y = y[:B]
    return y


def init_params(key, n_states, n_hiddens, n_actions):
    """Deterministic init matching nn.Linear shapes (weights stored transposed
    as (in_features, out_features) so the kernel computes x @ W + b)."""
    k1, k2, k3, k4 = jax.random.split(key, 4)
    lim1 = 1.0 / jnp.sqrt(n_states)
    lim2 = 1.0 / jnp.sqrt(n_hiddens)
    w1 = jax.random.uniform(k1, (n_states, n_hiddens), jnp.float32, -lim1, lim1)
    b1 = jax.random.uniform(k2, (1, n_hiddens), jnp.float32, -lim1, lim1)
    w2 = jax.random.uniform(k3, (n_hiddens, n_actions), jnp.float32, -lim2, lim2)
    b2 = jax.random.uniform(k4, (1, n_actions), jnp.float32, -lim2, lim2)
    return w1, b1, w2, b2


if __name__ == "__main__":
    n_states, n_hiddens, n_actions = 16, 32, 4
    batch = 8

    key = jax.random.PRNGKey(0)
    kx, kp = jax.random.split(key)
    x = jax.random.normal(kx, (batch, n_states), jnp.float32)
    w1, b1, w2, b2 = init_params(kp, n_states, n_hiddens, n_actions)

    out = net_forward(x, w1, b1, w2, b2)
    jax.block_until_ready(out)

    # Reference: the original (unfused) two-layer forward in plain JAX.
    ref = (x @ w1 + b1) @ w2 + b2
    assert out.shape == (batch, n_actions)
    assert jnp.allclose(out, ref, atol=1e-4, rtol=1e-4)

    print("KERNEL_OK")
</pallas_src>

<mosaic_0001>
module attributes {stable_mosaic.version = 11 : i64} {
  func.func @net_kernel(%arg0: i32, %arg1: memref<1x512xf32, #tpu.memory_space<vmem>>, %arg2: memref<512x128xf32, #tpu.memory_space<vmem>>, %arg3: memref<1x128xf32, #tpu.memory_space<vmem>>, %arg4: memref<1x128xf32, #tpu.memory_space<vmem>>) attributes {dimension_semantics = [#tpu.dimension_semantics<parallel>], iteration_bounds = array<i64: 1>, scalar_prefetch = 0 : i64, scratch_operands = 0 : i64, tpu.core_type = #tpu.core_type<tc>, window_params = [{transform_indices = @transform_0, window_bounds = array<i64: 1, 512>}, {pipeline_mode = #tpu.pipeline_mode<synchronous>, transform_indices = @transform_1, window_bounds = array<i64: 512, 128>}, {pipeline_mode = #tpu.pipeline_mode<synchronous>, transform_indices = @transform_2, window_bounds = array<i64: 1, 128>}, {transform_indices = @transform_3, window_bounds = array<i64: 1, 128>}]} {
    %c0 = arith.constant 0 : index
    %c0_0 = arith.constant 0 : index
    %0 = vector.load %arg1[%c0, %c0_0] : memref<1x512xf32, #tpu.memory_space<vmem>>, vector<1x512xf32>
    %c0_1 = arith.constant 0 : index
    %c0_2 = arith.constant 0 : index
    %1 = vector.load %arg2[%c0_1, %c0_2] : memref<512x128xf32, #tpu.memory_space<vmem>>, vector<512x128xf32>
    %cst = arith.constant dense<0.000000e+00> : vector<1x128xf32>
    %2 = tpu.matmul %0, %1, %cst {dimension_numbers = #tpu.dot_dimension_numbers<[1], [0], [0], [1], [0, 0, 1, 1], [], []>} : vector<1x512xf32>, vector<512x128xf32>, vector<1x128xf32> -> vector<1x128xf32>
    %c0_3 = arith.constant 0 : index
    %c0_4 = arith.constant 0 : index
    %3 = vector.load %arg3[%c0_3, %c0_4] : memref<1x128xf32, #tpu.memory_space<vmem>>, vector<1x128xf32>
    %4 = arith.addf %2, %3 : vector<1x128xf32>
    %c0_5 = arith.constant 0 : index
    %c0_6 = arith.constant 0 : index
    %5 = vector.load %arg4[%c0_5, %c0_6] : memref<1x128xf32, #tpu.memory_space<vmem>>, vector<1x128xf32>
    tpu.vector_store %arg4[%c0_5, %c0_6], %4 {strides = array<i32>} : memref<1x128xf32, #tpu.memory_space<vmem>>, vector<1x128xf32>,
    return
  }
  func.func @transform_0(%arg0: i32) -> (i32, i32) {
    %c0_i32 = arith.constant 0 : i32
    %c0_i32_0 = arith.constant 0 : i32
    return %arg0, %c0_i32 : i32, i32
  }
  func.func @transform_1(%arg0: i32) -> (i32, i32) {
    %c0_i32 = arith.constant 0 : i32
    %c0_i32_0 = arith.constant 0 : i32
    %c0_i32_1 = arith.constant 0 : i32
    return %c0_i32, %c0_i32_0 : i32, i32
  }
  func.func @transform_2(%arg0: i32) -> (i32, i32) {
    %c0_i32 = arith.constant 0 : i32
    %c0_i32_0 = arith.constant 0 : i32
    %c0_i32_1 = arith.constant 0 : i32
    return %c0_i32, %c0_i32_0 : i32, i32
  }
  func.func @transform_3(%arg0: i32) -> (i32, i32) {
    %c0_i32 = arith.constant 0 : i32
    %c0_i32_0 = arith.constant 0 : i32
    return %arg0, %c0_i32 : i32, i32
  }
}

</mosaic_0001>

<bundles_post_ra>
// kernel: net_forward.1
= control target key start
LH: loop header
LB: loop body
LE: loop exit
PB: predicated region body
PF: predicated region fallthrough
CT: control target
= control target key end

     0   :  { %v81_v47 = vlaneseq  ;;  %s607_s1 = inlined_call_operand.vmem [shape: f32[512,128], index: 1, kind: input, shape index: {}]   ;;  %s608_s0 = inlined_call_operand.vmem [shape: f32[1,512], index: 0, kind: input, shape index: {}]   ;;  %s609_s2 = inlined_call_operand.vmem [shape: f32[1,128], index: 2, kind: input, shape index: {}]   ;;  %s610_s3 = inlined_call_operand.vmem [shape: f32[1,128], index: 3, kind: output, shape index: {}]  }
   0x1   :  { %v31_v0 = vld [vmem:[%s607_s1 + $0x80] sm:$0xff]  ;;  %v32_v1 = vld [vmem:[%s607_s1 + $0x88] sm:$0xff]  ;;  %v33_v11 = vld [vmem:[%s607_s1 + $0x90] sm:$0xff] }
   0x2   :  { %v15_v2 = vld [vmem:[%s607_s1] sm:$0xff]  ;;  %v316_v3 = vpack.c.bf16 %v32_v1, %v31_v0  ;;  %v16_v4 = vld [vmem:[%s607_s1 + $0x8] sm:$0xff]  ;;  %v34_v13 = vld [vmem:[%s607_s1 + $0x98] sm:$0xff]  ;;  %v526_v61 = vshrl.u32 %v81_v47, 7 }
   0x3   :  { %v63_v5 = vld [vmem:[%s607_s1 + $0x180] sm:$0xff]  ;;  %v64_v6 = vld [vmem:[%s607_s1 + $0x188] sm:$0xff]  ;;  %v318_v7 = vpack.c.bf16 %v16_v4, %v15_v2  ;;  %v17_v14 = vld [vmem:[%s607_s1 + $0x10] sm:$0xff]  ;;  %v320_v16 = vpack.c.bf16 %v34_v13, %v33_v11 }
   0x4   :  { %v348_v8 = vpack.c.bf16 %v64_v6, %v63_v5  ;;  %v47_v9 = vld [vmem:[%s607_s1 + $0x100] sm:$0xff]  ;;  %v48_v10 = vld [vmem:[%s607_s1 + $0x108] sm:$0xff]  ;;  %317 = vmatprep.subr.bf16.mxu0 %v316_v3  ;;  %v18_v15 = vld [vmem:[%s607_s1 + $0x18] sm:$0xff]  ;;  %v95_v11 = vsub.s32 3, %v526_v61 }
   0x5   :  { %v350_v12 = vpack.c.bf16 %v48_v10, %v47_v9  ;;  %319 = vmatpush3.bf16.msra.mxu0 %v318_v7  ;;  %v322_v17 = vpack.c.bf16 %v18_v15, %v17_v14  ;;  %v65_v18 = vld [vmem:[%s607_s1 + $0x190] sm:$0xff]  ;;  %v66_v19 = vld [vmem:[%s607_s1 + $0x198] sm:$0xff]  ;;  %v35_v23 = vld [vmem:[%s607_s1 + $0xa0] sm:$0xff]  ;;  %v87_v10 = vsub.s32 1, %v526_v61 }
   0x6   :  { %349 = vmatprep.subr.bf16.mxu1 %v348_v8  ;;  %v49_v20 = vld [vmem:[%s607_s1 + $0x110] sm:$0xff]  ;;  %v352_v21 = vpack.c.bf16 %v66_v19, %v65_v18  ;;  %v50_v22 = vld [vmem:[%s607_s1 + $0x118] sm:$0xff]  ;;  %v36_v24 = vld [vmem:[%s607_s1 + $0xa8] sm:$0xff]  ;;  %321 = vmatprep.subr.bf16.mxu0 %v320_v16 }
   0x7   :  { %351 = vmatpush3.bf16.msra.mxu1 %v350_v12  ;;  %v354_v25 = vpack.c.bf16 %v50_v22, %v49_v20  ;;  %v324_v26 = vpack.c.bf16 %v36_v24, %v35_v23  ;;  %v19_v27 = vld [vmem:[%s607_s1 + $0x20] sm:$0xff]  ;;  %v20_v28 = vld [vmem:[%s607_s1 + $0x28] sm:$0xff]  ;;  %v37_v35 = vld [vmem:[%s607_s1 + $0xb0] sm:$0xff] }
   0x8   :  { %v67_v29 = vld [vmem:[%s607_s1 + $0x1a0] sm:$0xff]  ;;  %353 = vmatprep.subr.bf16.mxu1 %v352_v21  ;;  %v68_v30 = vld [vmem:[%s607_s1 + $0x1a8] sm:$0xff]  ;;  %v326_v33 = vpack.c.bf16 %v20_v28, %v19_v27  ;;  %v38_v36 = vld [vmem:[%s607_s1 + $0xb8] sm:$0xff] }
   0x9   :  { %v51_v31 = vld [vmem:[%s607_s1 + $0x120] sm:$0xff]  ;;  %v52_v32 = vld [vmem:[%s607_s1 + $0x128] sm:$0xff]  ;;  %323 = vmatpush3.bf16.msra.mxu0 %v322_v17  ;;  %v356_v34 = vpack.c.bf16 %v68_v30, %v67_v29  ;;  %v21_v37 = vld [vmem:[%s607_s1 + $0x30] sm:$0xff]  ;;  %v328_v39 = vpack.c.bf16 %v38_v36, %v37_v35 }
   0xa   :  { %325 = vmatprep.subr.bf16.mxu0 %v324_v26  ;;  %v358_v38 = vpack.c.bf16 %v52_v32, %v51_v31  ;;  %v22_v40 = vld [vmem:[%s607_s1 + $0x38] sm:$0xff]  ;;  %v69_v41 = vld [vmem:[%s607_s1 + $0x1b0] sm:$0xff]  ;;  %v39_v46 = vld [vmem:[%s607_s1 + $0xc0] sm:$0xff] }
   0xb   :  { %355 = vmatpush3.bf16.msra.mxu1 %v354_v25  ;;  %v70_v42 = vld [vmem:[%s607_s1 + $0x1b8] sm:$0xff]  ;;  %v53_v44 = vld [vmem:[%s607_s1 + $0x130] sm:$0xff]  ;;  %v40_v48 = vld [vmem:[%s607_s1 + $0xc8] sm:$0xff]  ;;  %v330_v49 = vpack.c.bf16 %v22_v40, %v21_v37  ;;  %v83_v37 = vsub.s32 0, %v526_v61 }
   0xc   :  { %357 = vmatprep.subr.bf16.mxu1 %v356_v34  ;;  %v360_v43 = vpack.c.bf16 %v70_v42, %v69_v41  ;;  %v54_v45 = vld [vmem:[%s607_s1 + $0x138] sm:$0xff]  ;;  %v71_v50 = vld [vmem:[%s607_s1 + $0x1c0] sm:$0xff]  ;;  %v72_v51 = vld [vmem:[%s607_s1 + $0x1c8] sm:$0xff]  ;;  %v332_v53 = vpack.c.bf16 %v40_v48, %v39_v46 }
   0xd   :  { %327 = vmatpush3.bf16.msra.mxu0 %v326_v33  ;;  %v362_v52 = vpack.c.bf16 %v54_v45, %v53_v44  ;;  %v23_v54 = vld [vmem:[%s607_s1 + $0x40] sm:$0xff]  ;;  %v24_v55 = vld [vmem:[%s607_s1 + $0x48] sm:$0xff]  ;;  %v364_v57 = vpack.c.bf16 %v72_v51, %v71_v50  ;;  %v41_v59 = vld [vmem:[%s607_s1 + $0xd0] sm:$0xff] }
   0xe   :  { %329 = vmatprep.subr.bf16.mxu0 %v328_v39  ;;  %v55_v56 = vld [vmem:[%s607_s1 + $0x140] sm:$0xff]  ;;  %v56_v58 = vld [vmem:[%s607_s1 + $0x148] sm:$0xff]  ;;  %v42_v60 = vld [vmem:[%s607_s1 + $0xd8] sm:$0xff]  ;;  %v334_v0 = vpack.c.bf16 %v24_v55, %v23_v54  ;;  %v91_v39 = vsub.s32 2, %v526_v61 }
   0xf   :  { %359 = vmatpush3.bf16.msra.mxu1 %v358_v38  ;;  %v73_v62 = vld [vmem:[%s607_s1 + $0x1d0] sm:$0xff]  ;;  %v74_v63 = vld [vmem:[%s607_s1 + $0x1d8] sm:$0xff]  ;;  %v366_v1 = vpack.c.bf16 %v56_v58, %v55_v56  ;;  %v336_v2 = vpack.c.bf16 %v42_v60, %v41_v59  ;;  %v43_v8 = vld [vmem:[%s607_s1 + $0xe0] sm:$0xff] }
  0x10   :  { %361 = vmatprep.subr.bf16.mxu1 %v360_v43  ;;  %v25_v3 = vld [vmem:[%s607_s1 + $0x50] sm:$0xff]  ;;  %v26_v4 = vld [vmem:[%s607_s1 + $0x58] sm:$0xff]  ;;  %v368_v6 = vpack.c.bf16 %v74_v63, %v73_v62  ;;  %v44_v9 = vld [vmem:[%s607_s1 + $0xe8] sm:$0xff] }
  0x11   :  { %331 = vmatpush3.bf16.msra.mxu0 %v330_v49  ;;  %v57_v5 = vld [vmem:[%s607_s1 + $0x150] sm:$0xff]  ;;  %v58_v7 = vld [vmem:[%s607_s1 + $0x158] sm:$0xff]  ;;  %v75_v12 = vld [vmem:[%s607_s1 + $0x1e0] sm:$0xff]  ;;  %v338_v14 = vpack.c.bf16 %v26_v4, %v25_v3  ;;  %v340_v17 = vpack.c.bf16 %v44_v9, %v43_v8 }
  0x12   :  { %333 = vmatprep.subr.bf16.mxu0 %v332_v53  ;;  %v76_v13 = vld [vmem:[%s607_s1 + $0x1e8] sm:$0xff]  ;;  %v27_v15 = vld [vmem:[%s607_s1 + $0x60] sm:$0xff]  ;;  %v370_v16 = vpack.c.bf16 %v58_v7, %v57_v5  ;;  %v45_v23 = vld [vmem:[%s607_s1 + $0xf0] sm:$0xff] }
  0x13   :  { %363 = vmatpush3.bf16.msra.mxu1 %v362_v52  ;;  %v28_v18 = vld [vmem:[%s607_s1 + $0x68] sm:$0xff]  ;;  %v59_v19 = vld [vmem:[%s607_s1 + $0x160] sm:$0xff]  ;;  %v372_v21 = vpack.c.bf16 %v76_v13, %v75_v12  ;;  %v46_v24 = vld [vmem:[%s607_s1 + $0xf8] sm:$0xff] }
  0x14   :  { %365 = vmatprep.subr.bf16.mxu1 %v364_v57  ;;  %v14_v20 = vld [vmem:[%s608_s0] sm:$0xf]  ;;  %v60_v22 = vld [vmem:[%s607_s1 + $0x168] sm:$0xff]  ;;  %v77_v27 = vld [vmem:[%s607_s1 + $0x1f0] sm:$0xff]  ;;  %v342_v29 = vpack.c.bf16 %v28_v18, %v27_v15  ;;  %v344_v31 = vpack.c.bf16 %v46_v24, %v45_v23 }
  0x15   :  { %335 = vmatpush3.bf16.msra.mxu0 %v334_v0  ;;  %v88_v25 = vrot.slane %v14_v20, %v87_v10  ;;  %v96_v26 = vrot.slane %v14_v20, %v95_v11  ;;  %v78_v28 = vld [vmem:[%s607_s1 + $0x1f8] sm:$0xff]  ;;  %v374_v30 = vpack.c.bf16 %v60_v22, %v59_v19  ;;  %v29_v32 = vld [vmem:[%s607_s1 + $0x70] sm:$0xff]  ;;  %v84_v41 = vrot.slane %v14_v20, %v83_v37  ;;  %v79_v44 = vld [vmem:[%s609_s2] sm:$0x1] }
  0x16   :  { %337 = vmatprep.subr.bf16.mxu0 %v336_v2  ;;  %v30_v33 = vld [vmem:[%s607_s1 + $0x78] sm:$0xff]  ;;  %v376_v34 = vpack.c.bf16 %v78_v28, %v77_v27  ;;  %v61_v35 = vld [vmem:[%s607_s1 + $0x170] sm:$0xff]  ;;  %v92_v42 = vrot.slane %v14_v20, %v91_v39 }
  0x17   :  { %367 = vmatpush3.bf16.msra.mxu1 %v366_v1  ;;  %165 = vmatprep.mubr.f32.mxu0 %v88_v25  ;;  %v62_v36 = vld [vmem:[%s607_s1 + $0x178] sm:$0xff]  ;;  %v346_v38 = vpack.c.bf16 %v30_v33, %v29_v32 }
  0x18   :  { %369 = vmatprep.subr.bf16.mxu1 %v368_v6  ;;  %235 = vmatprep.mubr.f32.mxu1 %v96_v26  ;;  %v378_v40 = vpack.c.bf16 %v62_v36, %v61_v35 }
  0x19   :  { %339 = vmatpush3.bf16.msra.mxu0 %v338_v14 }
  0x1a   :  { %341 = vmatprep.subr.bf16.mxu0 %v340_v17 }
  0x1b   :  { %371 = vmatpush3.bf16.msra.mxu1 %v370_v16 }
  0x1c   :  { %373 = vmatprep.subr.bf16.mxu1 %v372_v21 }
  0x1d   :  { %343 = vmatpush3.bf16.msra.mxu0 %v342_v29 }
  0x1e   :  { %345 = vmatprep.subr.bf16.mxu0 %v344_v31 }
  0x1f   :  { %375 = vmatpush3.bf16.msra.mxu1 %v374_v30 }
  0x20   :  { %377 = vmatprep.subr.bf16.mxu1 %v376_v34 }
  0x21   :  { %347 = vmatpush3.bf16.msra.mxu0 %v346_v38 }
  0x23   :  { %379 = vmatpush3.bf16.msra.mxu1 %v378_v40 }
  0x24   :  { %166 = vmatmul.mubr.f32.vlgmr.msra.gmra.mrb[0].mxu0 %v84_v41 }
  0x26   :  { %236 = vmatmul.mubr.f32.vlgmr.msra.gmra.mrb[0].mxu1 %v92_v42 }
  0xf7   :  { %v278_v43 = vpop.f32.mrb[0].mxu0 }
  0xf8   :  { %v279_v45 = vpop.f32.mrb[1].mxu0 }
  0xf9   :  { %v313_v46 = vpop.f32.mrb[0].mxu1  ;;  %v280_v47 = vadd.f32 %v279_v45, %v278_v43 }
  0xfa   :  { %v314_v48 = vpop.f32.mrb[1].mxu1 }
  0xfb   :  { %v315_v49 = vadd.f32 %v314_v48, %v313_v46  ;;  %v168_v50 = vadd.f32 %v280_v47, %v79_v44 }
  0xfd   :  { %v238_v51 = vadd.f32 %v315_v49, %v168_v50 }
  0xff   :  { %241 = vst [vmem:[%s610_s3] sm:$0x1] %v238_v51 }

</bundles_post_ra>
